<compile_context>
chip_gen: v7x
topology: tpu7x:2x2x1
jax: 0.10.0
libtpu: 0.0.40
codegen_flags: <defaults>
</compile_context>

<pallas_src>
import functools

import jax
import jax.numpy as jnp
from jax.experimental import pallas as pl
from jax.experimental.pallas import tpu as pltpu


def _make_deep_fm_kernel(n_sparse):
    """Kernel over transposed (feature, batch) tiles; batch on the lane axis."""

    def kernel(*refs):
        # in_refs (order matches the pallas_call operand order):
        #   ids_ref        (n_sparse, TB) int32   VMEM  (batch tile of sparse ids)
        #   dense_ref      (n_dense,  TB) f32     VMEM  (batch tile of dense feats)
        #   emb_refs[i]    (E, V_i)       f32     VMEM  (E_i^T, resident)
        #   w1s_refs[i]    (H1, E)        f32     VMEM  (W1 rows for field i, transposed)
        #   w1d_ref        (H1, n_dense)  f32     VMEM
        #   b1_ref         (H1, 1)        f32     VMEM
        #   w2_ref         (H2, H1)       f32     VMEM  (W2^T)
        #   b2_ref         (H2, 1)        f32     VMEM
        #   w3_ref         (H2, 1)        f32     VMEM  (W3 column)
        #   scal_ref       (4,)           f32     SMEM  [b3, wo0, wo1, bo]
        # out_refs:
        #   o_ref          (1, TB)        f32     VMEM  (lane-dense output slab)
        idx = 0
        ids_ref = refs[idx]; idx += 1
        dense_ref = refs[idx]; idx += 1
        emb_refs = refs[idx:idx + n_sparse]; idx += n_sparse
        w1s_refs = refs[idx:idx + n_sparse]; idx += n_sparse
        w1d_ref = refs[idx]; idx += 1
        b1_ref = refs[idx]; idx += 1
        w2_ref = refs[idx]; idx += 1
        b2_ref = refs[idx]; idx += 1
        w3_ref = refs[idx]; idx += 1
        scal_ref = refs[idx]; idx += 1
        o_ref = refs[idx]

        tb = ids_ref.shape[1]
        dense_t = dense_ref[...]                                        # (nd, TB)
        ids_all = ids_ref[...]                                          # (ns, TB) i32

        # Layer-1 contribution of the dense features + FM partial sums.
        h1 = jnp.dot(w1d_ref[...], dense_t,
                     preferred_element_type=jnp.float32)                # (H1, TB)
        s = jnp.sum(dense_t, axis=0, keepdims=True)                     # (1, TB)
        q = jnp.sum(dense_t * dense_t, axis=0, keepdims=True)           # (1, TB)

        # Fused embedding gather: one-hot (V_i, TB) built on the VPU, pushed
        # through the MXU: emb_i^T = E_i^T @ onehot_i.
        for i in range(n_sparse):
            v = emb_refs[i].shape[1]
            ids_row = ids_all[i:i + 1, :]                               # (1, TB)
            iota = jax.lax.broadcasted_iota(jnp.int32, (v, tb), 0)      # (V, TB)
            onehot = (iota == ids_row).astype(jnp.float32)              # (V, TB)
            emb_t = jnp.dot(emb_refs[i][...], onehot,
                            preferred_element_type=jnp.float32)         # (E, TB)
            h1 = h1 + jnp.dot(w1s_refs[i][...], emb_t,
                              preferred_element_type=jnp.float32)       # (H1, TB)
            s = s + jnp.sum(emb_t, axis=0, keepdims=True)
            q = q + jnp.sum(emb_t * emb_t, axis=0, keepdims=True)

        # Deep branch: Linear -> ReLU (x3).  Dropout = identity (eval mode).
        h1 = jnp.maximum(h1 + b1_ref[...], 0.0)                         # (H1, TB)
        h2 = jnp.dot(w2_ref[...], h1, preferred_element_type=jnp.float32)
        h2 = jnp.maximum(h2 + b2_ref[...], 0.0)                         # (H2, TB)
        # Layer 3 has out_features == 1: weighted sublane reduction instead of
        # an N=1 matmul.
        b3 = scal_ref[0]
        deep = jnp.sum(h2 * w3_ref[...], axis=0, keepdims=True) + b3    # (1, TB)
        deep = jnp.maximum(deep, 0.0)

        # FM second-order term over the full concatenated feature vector.
        fm = 0.5 * (s * s - q)                                          # (1, TB)

        # Final Linear(2, 1) + sigmoid; scalars read from SMEM.
        wo0 = scal_ref[1]
        wo1 = scal_ref[2]
        bo = scal_ref[3]
        o_ref[...] = jax.nn.sigmoid(fm * wo0 + deep * wo1 + bo)

    return kernel


def deep_fm_pallas(ids_t, dense_t, emb_ts, w1s_ts, w1d_t, b1_t, w2_t, b2_t,
                   w3_c, scalars, *, block_b):
    """ids_t: (n_sparse, Bp) int32, dense_t: (n_dense, Bp) f32, Bp % block_b == 0."""
    n_sparse = len(emb_ts)
    n_dense = dense_t.shape[0]
    bp = dense_t.shape[1]
    assert bp % block_b == 0
    grid = (bp // block_b,)

    def resident(a):
        zeros = (0,) * a.ndim
        return pl.BlockSpec(a.shape, lambda i: zeros)   # constant block -> stays in VMEM

    in_specs = (
        [pl.BlockSpec((n_sparse, block_b), lambda i: (0, i)),
         pl.BlockSpec((n_dense, block_b), lambda i: (0, i))]
        + [resident(e) for e in emb_ts]
        + [resident(w) for w in w1s_ts]
        + [resident(w1d_t), resident(b1_t), resident(w2_t), resident(b2_t),
           resident(w3_c),
           pl.BlockSpec(memory_space=pltpu.MemorySpace.SMEM)]
    )

    return pl.pallas_call(
        _make_deep_fm_kernel(n_sparse),
        out_shape=jax.ShapeDtypeStruct((1, bp), jnp.float32),
        grid=grid,
        in_specs=in_specs,
        out_specs=pl.BlockSpec((1, block_b), lambda i: (0, i)),
        compiler_params=pltpu.CompilerParams(
            dimension_semantics=("parallel",),
            vmem_limit_bytes=32 * 1024 * 1024),
    )(ids_t, dense_t, *emb_ts, *w1s_ts, w1d_t, b1_t, w2_t, b2_t, w3_c, scalars)


def deep_fm_forward(x, emb_tables, params, *, n_dense, block_b=512):
    """Wrapper: transpose/split inputs + params (trace-time glue), call kernel.

    params = (w1, b1, w2, b2, w3, b3, wo, bo); Linear weights stored
    (in_features, out_features), i.e. already transposed from PyTorch layout.
    """
    w1, b1, w2, b2, w3, b3, wo, bo = params
    n_sparse = len(emb_tables)
    emb_dim = emb_tables[0].shape[1]

    dense_t = x[:, :n_dense].astype(jnp.float32).T                      # (nd, B)
    ids_t = x[:, n_dense:].astype(jnp.int32).T                          # (ns, B)

    b = x.shape[0]
    bp = pl.cdiv(b, block_b) * block_b
    if bp != b:
        dense_t = jnp.pad(dense_t, ((0, 0), (0, bp - b)))
        ids_t = jnp.pad(ids_t, ((0, 0), (0, bp - b)))                   # id 0 is valid

    # Transposed / split parameters (tiny, trace-time reshapes).
    emb_ts = [t.T for t in emb_tables]                                  # (E, V_i)
    w1s_ts = [w1[i * emb_dim:(i + 1) * emb_dim, :].T for i in range(n_sparse)]
    w1d_t = w1[n_sparse * emb_dim:, :].T                                # (H1, nd)
    b1_t = b1.reshape(-1, 1).astype(jnp.float32)                        # (H1, 1)
    w2_t = w2.T                                                         # (H2, H1)
    b2_t = b2.reshape(-1, 1).astype(jnp.float32)                        # (H2, 1)
    w3_c = w3.reshape(-1, 1).astype(jnp.float32)                        # (H2, 1)
    scalars = jnp.stack([b3.reshape(()), wo.reshape(-1)[0],
                         wo.reshape(-1)[1], bo.reshape(())]).astype(jnp.float32)

    out_t = deep_fm_pallas(ids_t, dense_t, emb_ts, w1s_ts, w1d_t, b1_t, w2_t,
                           b2_t, w3_c, scalars, block_b=block_b)        # (1, Bp)
    out = out_t.reshape(bp, 1)
    return out[:b] if bp != b else out


def deep_fm_reference(x, emb_tables, n_dense, params):
    """Pure-JAX reference of the PyTorch forward (eval mode)."""
    w1, b1, w2, b2, w3, b3, wo, bo = params
    dense_input = x[:, :n_dense].astype(jnp.float32)
    sparse_ids = x[:, n_dense:].astype(jnp.int32)
    embs = [jnp.take(emb_tables[i], sparse_ids[:, i], axis=0)
            for i in range(sparse_ids.shape[1])]
    xcat = jnp.concatenate(embs + [dense_input], axis=-1)
    h = jnp.maximum(xcat @ w1 + b1, 0.0)
    h = jnp.maximum(h @ w2 + b2, 0.0)
    deep = jnp.maximum(h @ w3 + b3, 0.0)
    s = jnp.sum(xcat, axis=1, keepdims=True)
    q = jnp.sum(xcat * xcat, axis=1, keepdims=True)
    fm = 0.5 * (s * s - q)
    z = jnp.concatenate([fm, deep], axis=-1) @ wo + bo
    return jax.nn.sigmoid(z)


if __name__ == "__main__":
    key = jax.random.PRNGKey(0)

    # Module config: 3 dense features, 2 sparse features (vocab 8 and 12),
    # embedding_dim = 10, hidden_units = [32, 16, 1].
    n_dense = 3
    sparse_vocabs = [8, 12]
    emb_dim = 10
    hidden_units = [32, 16, 1]
    B = 1000          # deliberately not a multiple of TB to exercise padding
    TB = 512          # batch tile (lane-dense; grid of 2 after padding)

    in_dim = n_dense + len(sparse_vocabs) * emb_dim                     # 23
    dims = [in_dim] + hidden_units                                      # [23, 32, 16, 1]

    keys = jax.random.split(key, 16)
    emb_tables = [
        0.1 * jax.random.normal(keys[i], (v, emb_dim), dtype=jnp.float32)
        for i, v in enumerate(sparse_vocabs)
    ]
    w1 = 0.1 * jax.random.normal(keys[4], (dims[0], dims[1]), dtype=jnp.float32)
    b1 = 0.1 * jax.random.normal(keys[5], (1, dims[1]), dtype=jnp.float32)
    w2 = 0.1 * jax.random.normal(keys[6], (dims[1], dims[2]), dtype=jnp.float32)
    b2 = 0.1 * jax.random.normal(keys[7], (1, dims[2]), dtype=jnp.float32)
    w3 = 0.1 * jax.random.normal(keys[8], (dims[2], dims[3]), dtype=jnp.float32)
    b3 = 0.1 * jax.random.normal(keys[9], (1, dims[3]), dtype=jnp.float32)
    wo = 0.1 * jax.random.normal(keys[10], (2, 1), dtype=jnp.float32)
    bo = 0.1 * jax.random.normal(keys[11], (1, 1), dtype=jnp.float32)
    params = (w1, b1, w2, b2, w3, b3, wo, bo)

    # Input: (B, n_dense + n_sparse); sparse columns hold integer ids stored as
    # floats (the module casts them with .long()).
    dense_part = jax.random.normal(keys[12], (B, n_dense), dtype=jnp.float32)
    sparse_part = jnp.stack(
        [jax.random.randint(keys[13 + i], (B,), 0, v).astype(jnp.float32)
         for i, v in enumerate(sparse_vocabs)], axis=1)
    x = jnp.concatenate([dense_part, sparse_part], axis=1)              # (B, 5)

    # TODO(synk): nn.Dropout(0.2) is stochastic in train mode; modeled as identity (eval).
    fwd = jax.jit(functools.partial(deep_fm_forward, n_dense=n_dense, block_b=TB))
    out = jax.block_until_ready(fwd(x, emb_tables, params))
    assert out.shape == (B, 1)

    ref = jax.block_until_ready(deep_fm_reference(x, emb_tables, n_dense, params))
    assert jnp.allclose(out, ref, atol=2e-5, rtol=1e-4), \
        float(jnp.max(jnp.abs(out - ref)))
    print("KERNEL_OK")
</pallas_src>

<mosaic_0001>
module attributes {stable_mosaic.version = 11 : i64} {
  func.func @kernel(%arg0: i32, %arg1: memref<2x512xi32, #tpu.memory_space<vmem>>, %arg2: memref<3x512xf32, #tpu.memory_space<vmem>>, %arg3: memref<10x8xf32, #tpu.memory_space<vmem>>, %arg4: memref<10x12xf32, #tpu.memory_space<vmem>>, %arg5: memref<32x10xf32, #tpu.memory_space<vmem>>, %arg6: memref<32x10xf32, #tpu.memory_space<vmem>>, %arg7: memref<32x3xf32, #tpu.memory_space<vmem>>, %arg8: memref<32x1xf32, #tpu.memory_space<vmem>>, %arg9: memref<16x32xf32, #tpu.memory_space<vmem>>, %arg10: memref<16x1xf32, #tpu.memory_space<vmem>>, %arg11: memref<16x1xf32, #tpu.memory_space<vmem>>, %arg12: memref<4xf32, #tpu.memory_space<smem>>, %arg13: memref<1x512xf32, #tpu.memory_space<vmem>>) attributes {dimension_semantics = [#tpu.dimension_semantics<parallel>], iteration_bounds = array<i64: 2>, scalar_prefetch = 0 : i64, scratch_operands = 0 : i64, tpu.core_type = #tpu.core_type<tc>, window_params = [{transform_indices = @transform_0, window_bounds = array<i64: 2, 512>}, {transform_indices = @transform_1, window_bounds = array<i64: 3, 512>}, {pipeline_mode = #tpu.pipeline_mode<synchronous>, transform_indices = @transform_2, window_bounds = array<i64: 10, 8>}, {pipeline_mode = #tpu.pipeline_mode<synchronous>, transform_indices = @transform_3, window_bounds = array<i64: 10, 12>}, {pipeline_mode = #tpu.pipeline_mode<synchronous>, transform_indices = @transform_4, window_bounds = array<i64: 32, 10>}, {pipeline_mode = #tpu.pipeline_mode<synchronous>, transform_indices = @transform_5, window_bounds = array<i64: 32, 10>}, {pipeline_mode = #tpu.pipeline_mode<synchronous>, transform_indices = @transform_6, window_bounds = array<i64: 32, 3>}, {pipeline_mode = #tpu.pipeline_mode<synchronous>, transform_indices = @transform_7, window_bounds = array<i64: 32, 1>}, {pipeline_mode = #tpu.pipeline_mode<synchronous>, transform_indices = @transform_8, window_bounds = array<i64: 16, 32>}, {pipeline_mode = #tpu.pipeline_mode<synchronous>, transform_indices = @transform_9, window_bounds = array<i64: 16, 1>}, {pipeline_mode = #tpu.pipeline_mode<synchronous>, transform_indices = @transform_10, window_bounds = array<i64: 16, 1>}, {transform_indices = @transform_11, window_bounds = array<i64: 4>}, {transform_indices = @transform_12, window_bounds = array<i64: 1, 512>}]} {
    %c0 = arith.constant 0 : index
    %c0_0 = arith.constant 0 : index
    %0 = vector.load %arg2[%c0, %c0_0] : memref<3x512xf32, #tpu.memory_space<vmem>>, vector<3x512xf32>
    %c0_1 = arith.constant 0 : index
    %c0_2 = arith.constant 0 : index
    %1 = vector.load %arg1[%c0_1, %c0_2] : memref<2x512xi32, #tpu.memory_space<vmem>>, vector<2x512xi32>
    %c0_3 = arith.constant 0 : index
    %c0_4 = arith.constant 0 : index
    %2 = vector.load %arg7[%c0_3, %c0_4] : memref<32x3xf32, #tpu.memory_space<vmem>>, vector<32x3xf32>
    %cst = arith.constant dense<0.000000e+00> : vector<32x512xf32>
    %3 = tpu.matmul %2, %0, %cst {dimension_numbers = #tpu.dot_dimension_numbers<[1], [0], [0], [1], [0, 0, 1, 1], [], []>} : vector<32x3xf32>, vector<3x512xf32>, vector<32x512xf32> -> vector<32x512xf32>
    %cst_5 = arith.constant dense<0.000000e+00> : vector<512xf32>
    %4 = vector.multi_reduction <add>, %0, %cst_5 [0] : vector<3x512xf32> to vector<512xf32>
    %5 = vector.shape_cast %4 : vector<512xf32> to vector<1x512xf32>
    %6 = arith.mulf %0, %0 : vector<3x512xf32>
    %cst_6 = arith.constant dense<0.000000e+00> : vector<512xf32>
    %7 = vector.multi_reduction <add>, %6, %cst_6 [0] : vector<3x512xf32> to vector<512xf32>
    %8 = vector.shape_cast %7 : vector<512xf32> to vector<1x512xf32>
    %9 = vector.extract_strided_slice %1 {offsets = [0, 0], sizes = [1, 512], strides = [1, 1]} : vector<2x512xi32> to vector<1x512xi32>
    %10 = tpu.iota {dimensions = array<i32: 0>} : vector<8x512xi32>
    %11 = vector.broadcast %9 : vector<1x512xi32> to vector<8x512xi32>
    %12 = arith.cmpi eq, %10, %11 : vector<8x512xi32>
    %13 = arith.extui %12 : vector<8x512xi1> to vector<8x512xi32>
    %14 = arith.sitofp %13 : vector<8x512xi32> to vector<8x512xf32>
    %c0_7 = arith.constant 0 : index
    %c0_8 = arith.constant 0 : index
    %15 = vector.load %arg3[%c0_7, %c0_8] : memref<10x8xf32, #tpu.memory_space<vmem>>, vector<10x8xf32>
    %cst_9 = arith.constant dense<0.000000e+00> : vector<10x512xf32>
    %16 = tpu.matmul %15, %14, %cst_9 {dimension_numbers = #tpu.dot_dimension_numbers<[1], [0], [0], [1], [0, 0, 1, 1], [], []>} : vector<10x8xf32>, vector<8x512xf32>, vector<10x512xf32> -> vector<10x512xf32>
    %c0_10 = arith.constant 0 : index
    %c0_11 = arith.constant 0 : index
    %17 = vector.load %arg5[%c0_10, %c0_11] : memref<32x10xf32, #tpu.memory_space<vmem>>, vector<32x10xf32>
    %cst_12 = arith.constant dense<0.000000e+00> : vector<32x512xf32>
    %18 = tpu.matmul %17, %16, %cst_12 {dimension_numbers = #tpu.dot_dimension_numbers<[1], [0], [0], [1], [0, 0, 1, 1], [], []>} : vector<32x10xf32>, vector<10x512xf32>, vector<32x512xf32> -> vector<32x512xf32>
    %19 = arith.addf %3, %18 : vector<32x512xf32>
    %cst_13 = arith.constant dense<0.000000e+00> : vector<512xf32>
    %20 = vector.multi_reduction <add>, %16, %cst_13 [0] : vector<10x512xf32> to vector<512xf32>
    %21 = vector.shape_cast %20 : vector<512xf32> to vector<1x512xf32>
    %22 = arith.addf %5, %21 : vector<1x512xf32>
    %23 = arith.mulf %16, %16 : vector<10x512xf32>
    %cst_14 = arith.constant dense<0.000000e+00> : vector<512xf32>
    %24 = vector.multi_reduction <add>, %23, %cst_14 [0] : vector<10x512xf32> to vector<512xf32>
    %25 = vector.shape_cast %24 : vector<512xf32> to vector<1x512xf32>
    %26 = arith.addf %8, %25 : vector<1x512xf32>
    %27 = vector.extract_strided_slice %1 {offsets = [1, 0], sizes = [1, 512], strides = [1, 1]} : vector<2x512xi32> to vector<1x512xi32>
    %28 = tpu.iota {dimensions = array<i32: 0>} : vector<12x512xi32>
    %29 = vector.broadcast %27 : vector<1x512xi32> to vector<12x512xi32>
    %30 = arith.cmpi eq, %28, %29 : vector<12x512xi32>
    %31 = arith.extui %30 : vector<12x512xi1> to vector<12x512xi32>
    %32 = arith.sitofp %31 : vector<12x512xi32> to vector<12x512xf32>
    %c0_15 = arith.constant 0 : index
    %c0_16 = arith.constant 0 : index
    %33 = vector.load %arg4[%c0_15, %c0_16] : memref<10x12xf32, #tpu.memory_space<vmem>>, vector<10x12xf32>
    %cst_17 = arith.constant dense<0.000000e+00> : vector<10x512xf32>
    %34 = tpu.matmul %33, %32, %cst_17 {dimension_numbers = #tpu.dot_dimension_numbers<[1], [0], [0], [1], [0, 0, 1, 1], [], []>} : vector<10x12xf32>, vector<12x512xf32>, vector<10x512xf32> -> vector<10x512xf32>
    %c0_18 = arith.constant 0 : index
    %c0_19 = arith.constant 0 : index
    %35 = vector.load %arg6[%c0_18, %c0_19] : memref<32x10xf32, #tpu.memory_space<vmem>>, vector<32x10xf32>
    %cst_20 = arith.constant dense<0.000000e+00> : vector<32x512xf32>
    %36 = tpu.matmul %35, %34, %cst_20 {dimension_numbers = #tpu.dot_dimension_numbers<[1], [0], [0], [1], [0, 0, 1, 1], [], []>} : vector<32x10xf32>, vector<10x512xf32>, vector<32x512xf32> -> vector<32x512xf32>
    %37 = arith.addf %19, %36 : vector<32x512xf32>
    %cst_21 = arith.constant dense<0.000000e+00> : vector<512xf32>
    %38 = vector.multi_reduction <add>, %34, %cst_21 [0] : vector<10x512xf32> to vector<512xf32>
    %39 = vector.shape_cast %38 : vector<512xf32> to vector<1x512xf32>
    %40 = arith.addf %22, %39 : vector<1x512xf32>
    %41 = arith.mulf %34, %34 : vector<10x512xf32>
    %cst_22 = arith.constant dense<0.000000e+00> : vector<512xf32>
    %42 = vector.multi_reduction <add>, %41, %cst_22 [0] : vector<10x512xf32> to vector<512xf32>
    %43 = vector.shape_cast %42 : vector<512xf32> to vector<1x512xf32>
    %44 = arith.addf %26, %43 : vector<1x512xf32>
    %c0_23 = arith.constant 0 : index
    %c0_24 = arith.constant 0 : index
    %45 = vector.load %arg8[%c0_23, %c0_24] : memref<32x1xf32, #tpu.memory_space<vmem>>, vector<32x1xf32>
    %46 = vector.broadcast %45 : vector<32x1xf32> to vector<32x512xf32>
    %47 = arith.addf %37, %46 : vector<32x512xf32>
    %cst_25 = arith.constant 0.000000e+00 : f32
    %48 = vector.broadcast %cst_25 : f32 to vector<32x512xf32>
    %49 = arith.maximumf %47, %48 : vector<32x512xf32>
    %c0_26 = arith.constant 0 : index
    %c0_27 = arith.constant 0 : index
    %50 = vector.load %arg9[%c0_26, %c0_27] : memref<16x32xf32, #tpu.memory_space<vmem>>, vector<16x32xf32>
    %cst_28 = arith.constant dense<0.000000e+00> : vector<16x512xf32>
    %51 = tpu.matmul %50, %49, %cst_28 {dimension_numbers = #tpu.dot_dimension_numbers<[1], [0], [0], [1], [0, 0, 1, 1], [], []>} : vector<16x32xf32>, vector<32x512xf32>, vector<16x512xf32> -> vector<16x512xf32>
    %c0_29 = arith.constant 0 : index
    %c0_30 = arith.constant 0 : index
    %52 = vector.load %arg10[%c0_29, %c0_30] : memref<16x1xf32, #tpu.memory_space<vmem>>, vector<16x1xf32>
    %53 = vector.broadcast %52 : vector<16x1xf32> to vector<16x512xf32>
    %54 = arith.addf %51, %53 : vector<16x512xf32>
    %cst_31 = arith.constant 0.000000e+00 : f32
    %55 = vector.broadcast %cst_31 : f32 to vector<16x512xf32>
    %56 = arith.maximumf %54, %55 : vector<16x512xf32>
    %c0_32 = arith.constant 0 : index
    %57 = memref.load %arg12[%c0_32] : memref<4xf32, #tpu.memory_space<smem>>
    %c0_33 = arith.constant 0 : index
    %c0_34 = arith.constant 0 : index
    %58 = vector.load %arg11[%c0_33, %c0_34] : memref<16x1xf32, #tpu.memory_space<vmem>>, vector<16x1xf32>
    %59 = vector.broadcast %58 : vector<16x1xf32> to vector<16x512xf32>
    %60 = arith.mulf %56, %59 : vector<16x512xf32>
    %cst_35 = arith.constant dense<0.000000e+00> : vector<512xf32>
    %61 = vector.multi_reduction <add>, %60, %cst_35 [0] : vector<16x512xf32> to vector<512xf32>
    %62 = vector.shape_cast %61 : vector<512xf32> to vector<1x512xf32>
    %63 = vector.broadcast %57 : f32 to vector<1x512xf32>
    %64 = arith.addf %62, %63 : vector<1x512xf32>
    %cst_36 = arith.constant 0.000000e+00 : f32
    %65 = vector.broadcast %cst_36 : f32 to vector<1x512xf32>
    %66 = arith.maximumf %64, %65 : vector<1x512xf32>
    %67 = arith.mulf %40, %40 : vector<1x512xf32>
    %68 = arith.subf %67, %44 : vector<1x512xf32>
    %cst_37 = arith.constant 5.000000e-01 : f32
    %69 = vector.broadcast %cst_37 : f32 to vector<1x512xf32>
    %70 = arith.mulf %69, %68 : vector<1x512xf32>
    %c1 = arith.constant 1 : index
    %71 = memref.load %arg12[%c1] : memref<4xf32, #tpu.memory_space<smem>>
    %c2 = arith.constant 2 : index
    %72 = memref.load %arg12[%c2] : memref<4xf32, #tpu.memory_space<smem>>
    %c3 = arith.constant 3 : index
    %73 = memref.load %arg12[%c3] : memref<4xf32, #tpu.memory_space<smem>>
    %74 = vector.broadcast %71 : f32 to vector<1x512xf32>
    %75 = arith.mulf %70, %74 : vector<1x512xf32>
    %76 = vector.broadcast %72 : f32 to vector<1x512xf32>
    %77 = arith.mulf %66, %76 : vector<1x512xf32>
    %78 = arith.addf %75, %77 : vector<1x512xf32>
    %79 = vector.broadcast %73 : f32 to vector<1x512xf32>
    %80 = arith.addf %78, %79 : vector<1x512xf32>
    %81 = arith.negf %80 : vector<1x512xf32>
    %82 = math.exp %81 : vector<1x512xf32>
    %cst_38 = arith.constant 1.000000e+00 : f32
    %83 = vector.broadcast %cst_38 : f32 to vector<1x512xf32>
    %84 = arith.addf %83, %82 : vector<1x512xf32>
    %85 = arith.divf %83, %84 : vector<1x512xf32>
    %c0_39 = arith.constant 0 : index
    %c0_40 = arith.constant 0 : index
    %86 = vector.load %arg13[%c0_39, %c0_40] : memref<1x512xf32, #tpu.memory_space<vmem>>, vector<1x512xf32>
    tpu.vector_store %arg13[%c0_39, %c0_40], %85 {strides = array<i32>} : memref<1x512xf32, #tpu.memory_space<vmem>>, vector<1x512xf32>,
    return
  }
  func.func @transform_0(%arg0: i32) -> (i32, i32) {
    %c0_i32 = arith.constant 0 : i32
    %c0_i32_0 = arith.constant 0 : i32
    return %c0_i32, %arg0 : i32, i32
  }
  func.func @transform_1(%arg0: i32) -> (i32, i32) {
    %c0_i32 = arith.constant 0 : i32
    %c0_i32_0 = arith.constant 0 : i32
    return %c0_i32, %arg0 : i32, i32
  }
  func.func @transform_2(%arg0: i32) -> (i32, i32) {
    %c0_i32 = arith.constant 0 : i32
    %c0_i32_0 = arith.constant 0 : i32
    %c0_i32_1 = arith.constant 0 : i32
    return %c0_i32, %c0_i32_0 : i32, i32
  }
  func.func @transform_3(%arg0: i32) -> (i32, i32) {
    %c0_i32 = arith.constant 0 : i32
    %c0_i32_0 = arith.constant 0 : i32
    %c0_i32_1 = arith.constant 0 : i32
    return %c0_i32, %c0_i32_0 : i32, i32
  }
  func.func @transform_4(%arg0: i32) -> (i32, i32) {
    %c0_i32 = arith.constant 0 : i32
    %c0_i32_0 = arith.constant 0 : i32
    %c0_i32_1 = arith.constant 0 : i32
    return %c0_i32, %c0_i32_0 : i32, i32
  }
  func.func @transform_5(%arg0: i32) -> (i32, i32) {
    %c0_i32 = arith.constant 0 : i32
    %c0_i32_0 = arith.constant 0 : i32
    %c0_i32_1 = arith.constant 0 : i32
    return %c0_i32, %c0_i32_0 : i32, i32
  }
  func.func @transform_6(%arg0: i32) -> (i32, i32) {
    %c0_i32 = arith.constant 0 : i32
    %c0_i32_0 = arith.constant 0 : i32
    %c0_i32_1 = arith.constant 0 : i32
    return %c0_i32, %c0_i32_0 : i32, i32
  }
  func.func @transform_7(%arg0: i32) -> (i32, i32) {
    %c0_i32 = arith.constant 0 : i32
    %c0_i32_0 = arith.constant 0 : i32
    %c0_i32_1 = arith.constant 0 : i32
    return %c0_i32, %c0_i32_0 : i32, i32
  }
  func.func @transform_8(%arg0: i32) -> (i32, i32) {
    %c0_i32 = arith.constant 0 : i32
    %c0_i32_0 = arith.constant 0 : i32
    %c0_i32_1 = arith.constant 0 : i32
    return %c0_i32, %c0_i32_0 : i32, i32
  }
  func.func @transform_9(%arg0: i32) -> (i32, i32) {
    %c0_i32 = arith.constant 0 : i32
    %c0_i32_0 = arith.constant 0 : i32
    %c0_i32_1 = arith.constant 0 : i32
    return %c0_i32, %c0_i32_0 : i32, i32
  }
  func.func @transform_10(%arg0: i32) -> (i32, i32) {
    %c0_i32 = arith.constant 0 : i32
    %c0_i32_0 = arith.constant 0 : i32
    %c0_i32_1 = arith.constant 0 : i32
    return %c0_i32, %c0_i32_0 : i32, i32
  }
  func.func @transform_11(%arg0: i32) -> i32 {
    %c0_i32 = arith.constant 0 : i32
    %c0_i32_0 = arith.constant 0 : i32
    return %c0_i32 : i32
  }
  func.func @transform_12(%arg0: i32) -> (i32, i32) {
    %c0_i32 = arith.constant 0 : i32
    %c0_i32_0 = arith.constant 0 : i32
    return %c0_i32, %arg0 : i32, i32
  }
}

</mosaic_0001>

<bundles_post_ra>
// kernel: deep_fm_forward.1
= control target key start
LH: loop header
LB: loop body
LE: loop exit
PB: predicated region body
PF: predicated region fallthrough
CT: control target
= control target key end

     0   :  { %17 = vsyncpa [#allocation3], 0  ;;  %s2542_s21 = smov 0   ;;  %s2970_s0 = inlined_call_operand.vmem [shape: s32[2,1024], index: 0, kind: input, shape index: {}]   ;;  %s2971_s1 = inlined_call_operand.vmem [shape: f32[3,1024], index: 1, kind: input, shape index: {}]   ;;  %s2972_s2 = inlined_call_operand.vmem [shape: f32[10,8], index: 2, kind: input, shape index: {}]   ;;  %s2973_s3 = inlined_call_operand.vmem [shape: f32[10,12], index: 3, kind: input, shape index: {}]   ;;  %s2974_s4 = inlined_call_operand.vmem [shape: f32[32,10], index: 4, kind: input, shape index: {}]   ;;  %s2975_s5 = inlined_call_operand.vmem [shape: f32[32,10], index: 5, kind: input, shape index: {}]   ;;  %s2976_s6 = inlined_call_operand.vmem [shape: f32[32,3], index: 6, kind: input, shape index: {}]   ;;  %s2977_s7 = inlined_call_operand.vmem [shape: f32[32,1], index: 7, kind: input, shape index: {}]   ;;  %s2978_s8 = inlined_call_operand.vmem [shape: f32[16,32], index: 8, kind: input, shape index: {}]   ;;  %s2979_s9 = inlined_call_operand.vmem [shape: f32[16,1], index: 9, kind: input, shape index: {}]   ;;  %s2980_s10 = inlined_call_operand.vmem [shape: f32[16,1], index: 10, kind: input, shape index: {}]   ;;  %s2981_s11 = inlined_call_operand.vmem [shape: f32[4], index: 11, kind: input, shape index: {}]   ;;  %s2982_s12 = inlined_call_operand.vmem [shape: f32[1,1024], index: 12, kind: output, shape index: {}]  }
   0x1 LB: > { %s2223_s22 = sadd.s32 4294967295, %s2469_s21   ;;  %p2225_p0 = scmp.ge.s32.totalorder %s2469_s21, 1  ;;  %s2469_s21 = sphi %s2542_s21, %s23_s21  }
   0x2   : > { %p316_p1 = scmp.lt.s32.totalorder %s2469_s21, 3  ;;  %s356_s25 = sshll.u32 %s2981_s11, 4  ;;  %s357_s25 = int_to_ptr.vmem [resolvable:$true] %s356_s25 }
   0x3   : > { %p2557_p3 = scmp.eq.s32.totalorder %s2223_s22, 0  ;;  %s2444_s28 = scalar_lea.vmem %s357_s25, 16 }
   0x4   : > { %p2553_p2 = pnand %p2225_p0, %p316_p1  ;;  %p2445_p6 = scmp.ne.s32.totalorder %s357_s25, %s2444_s28 }
   0x5   : > { %p2452_p10 = scmp.lt.s32.totalorder %s357_s25, %s357_s25  ;;  %p2453_p11 = scmp.lt.s32.totalorder %s2444_s28, %s2444_s28 }
   0x6   : > { %p2404_p4 = pneg %p2553_p2 }
   0x7   : > { %p2454_p12 = por %p2453_p11, %p2452_p10 }
   0x8   : > { %p2405_p5 = pnand %p2557_p3, %p2404_p4 }
   0xa   : > { %p2446_p7 = pneg %p2405_p5 }
   0xc   : > { %p2447_p8 = pnand %p2446_p7, %p2445_p6 }
   0xe   : > { %p2448_p9 = pneg %p2447_p8 }
  0x10   : > { %p2455_p13 = pnand %p2454_p12, %p2448_p9 }
  0x12   : > { %2458 = shalt.err (!%p2455_p13)
}
  0x13   : > { %s2471_s29 = smov [#allocation2]   ;;  %387 = sbr.rel (%p2553_p2) target bundleno = 1041 (0x411), region = 68 }
  0x14   : > { %2407 = dma.vmem_to_smem (!%p2405_p5), %s357_s25, 16, %s2471_s29, [#allocation3]  }
  0x1a   : > { %2464 = dma.done.wait (%p2557_p3), [#allocation3], 16  }
  0x1b   : > { %2466 = vsyncadd (%p2557_p3), [#allocation3], 4294967280 }
  0x1c   : > { %393 = sfence }
  0x1d   : > { %s2230_s30 = sshll.u32 %s2223_s22, 2  ;;  %v529_v0 = vlaneseq  ;;  %v2472_v1 = vmov 0.0   ;;  %vm577_vm0 = vcmask 64512   ;;  %v575_v16 = vld [vmem:[%s2972_s2] sm:$0xff]  ;;  %v2473_v17 = vmov 1.0   ;;  %s1999_s26 = sld [smem:[#allocation2]] }
  0x1e   : > { %p435_p0 = scmp.lt.s32.totalorder %s2230_s30, 7  ;;  %648 = vmatprep.mubr.f32.mxu0 %v2472_v1  ;;  %725 = vmatprep.mubr.f32.mxu1 %v2472_v1  ;;  %v576_v18 = vld [vmem:[%s2972_s2 + $0x8] sm:$0x3]  ;;  %vm755_vm6 = vcmask 1041408   ;;  %vm742_vm7 = vcmask 80896   ;;  %vm464_vm8 = vcmask 1042432  }
  0x1f   : > { %v2574_v2 = vshrl.u32 %v529_v0, 7  ;;  %vm1291_vm9 = vcmask 1043456   ;;  %vm2474_vm11 = vmmov 1   ;;  %v738_v61 = vld [vmem:[%s2974_s4] sm:$0xff]  ;;  %s2307_s27 = sld [smem:[#allocation2 + $0x1]]  ;;  %s2308_s28 = sld [smem:[#allocation2 + $0x2]] }
  0x20   : > { %s2988_s30 = smov (!%p435_p0, %s2230_s30), 7  ;;  %vm2647_vm12 = vmpackc.low %vm755_vm6, %vm2474_vm11  ;;  %s2309_s29 = sld [smem:[#allocation2 + $0x3]] }
  0x21   : > { %v533_v3 = vsub.s32 0, %v2574_v2  ;;  %v537_v4 = vsub.s32 2, %v2574_v2  ;;  %v545_v5 = vsub.s32 6, %v2574_v2  ;;  %v541_v6 = vsub.s32 4, %v2574_v2  ;;  %s2231_s13 = sshll.u32 %s2988_s30, 1  ;;  %s2233_s22 = sshll.u32 %s2988_s30, 2 }
  0x22   : > { %s438_s16 = scalar_lea.vmem %s2970_s0, %s2231_s13  ;;  %v1232_v19 = vsub.s32 3, %v2574_v2  ;;  %v1240_v20 = vsub.s32 7, %v2574_v2  ;;  %v2617_v21 = vsub.s32 1, %v2574_v2  ;;  %s2625_s25 = scalar_lea.vmem %s2971_s1, %s2233_s22  ;;  %v2628_v24 = vadd.s32 8, %v2574_v2 }
  0x23   : > { %v2586_v7 = vld [vmem:[%s438_s16] sm:$0xff]  ;;  %v2659_v53 = vld [vmem:[%s2625_s25 + $0x8] sm:$0x77]  ;;  %s449_s15 = scalar_lea.vmem %s2982_s12, %s2988_s30 }
  0x24   : > { %v538_v8 = vrot.slane %v2586_v7, %v537_v4  ;;  %v546_v9 = vrot.slane %v2586_v7, %v545_v5  ;;  %v534_v10 = vrot.slane %v2586_v7, %v533_v3  ;;  %v542_v11 = vrot.slane %v2586_v7, %v541_v6  ;;  %v2632_v28 = vld [vmem:[%s2625_s25] sm:$0x77] }
  0x25   : > { %v1233_v22 = vrot.slane %v2586_v7, %v1232_v19  ;;  %v1241_v23 = vrot.slane %v2586_v7, %v1240_v20  ;;  %v2640_v32 = vcombine.high %v2632_v28, %v2632_v28  ;;  %v2683_v63 = vcombine.high %v2659_v53, %v2659_v53  ;;  %v740_v19 = vld [vmem:[%s2974_s4 + $0x10] sm:$0xff]  ;;  %v741_v20 = vld [vmem:[%s2974_s4 + $0x18] sm:$0xff] }
  0x26   : > { %v554_v12 = vrot.slane %v538_v8, %v533_v3  ;;  %v562_v13 = vrot.slane %v546_v9, %v533_v3  ;;  %v550_v14 = vrot.slane %v534_v10, %v533_v3  ;;  %v558_v15 = vrot.slane %v542_v11, %v533_v3 }
  0x27   : > { %v1249_v25 = vrot.slane %v1233_v22, %v2617_v21  ;;  %v2635_v29 = vrot.slane %v1241_v23, %v2617_v21  ;;  %v1229_v3 = vrot.slane %v2586_v7, %v2617_v21  ;;  %v1236_v4 = vsub.s32 5, %v2574_v2 }
  0x28   : > { %vm564_vm1 = vcmp.eq.s32.totalorder %v2574_v2, %v554_v12  ;;  %vm566_vm2 = vcmp.eq.s32.totalorder %v2574_v2, %v562_v13  ;;  %vm563_vm3 = vcmp.eq.s32.totalorder %v2574_v2, %v550_v14  ;;  %vm565_vm4 = vcmp.eq.s32.totalorder %v2574_v2, %v558_v15  ;;  %v739_v13 = vld [vmem:[%s2974_s4 + $0x8] sm:$0xff] }
  0x29   : > { %2239 = vmatprep.subr.msk.mxu0 %vm564_vm1, %v2473_v17  ;;  %2243 = vmatprep.subr.msk.mxu1 %vm566_vm2, %v2473_v17  ;;  %vm1263_vm5 = vcmp.eq.s32.totalorder %v2628_v24, %v1249_v25  ;;  %vm1265_vm10 = vcmp.eq.s32.totalorder %v2628_v24, %v2635_v29  ;;  %vm1259_vm13 = vcmp.eq.s32.totalorder %v2574_v2, %v1249_v25 }
  0x2a   : > { %2240 = vmatpush1.msk.msra.mxu0 %vm563_vm3, %v2473_v17  ;;  %2244 = vmatpush1.msk.msra.mxu1 %vm565_vm4, %v2473_v17  ;;  %v2276_v37 = vsel %vm1263_vm5, 1.0, %v2472_v1  ;;  %v2278_v9 = vsel %vm1265_vm10, 1.0, %v2472_v1  ;;  %vm2329_vm14 = vmpackc.low %vm1291_vm9, %vm1259_vm13  ;;  %vm1261_vm15 = vcmp.eq.s32.totalorder %v2574_v2, %v2635_v29  ;;  %vm946_vm4 = vcmask 23552   ;;  %v1282_v29 = vld [vmem:[%s2973_s3] sm:$0xff] }
  0x2b   : > { %2241 = vmatmul.mubr.msk.f32.vlgmr.msra.gmra.mrb[0].mxu0 %vm577_vm0, %v575_v16  ;;  %2245 = vmatmul.mubr.msk.f32.vlgmr.msra.gmra.mrb[0].mxu1 %vm577_vm0, %v575_v16  ;;  %v2328_v8 = vpack.c.bf16 %v2276_v37, %v2473_v17  ;;  %v2334_v14 = vpack.c.bf16 %v2278_v9, %v2473_v17  ;;  %v1245_v16 = vrot.slane %v1229_v3, %v2617_v21  ;;  %v1818_v37 = vld [vmem:[%s2979_s9] sm:$0xff] }
  0x2c   : > { %654 = vmatprep.mubr.f32.mxu0 %v2472_v1  ;;  %731 = vmatprep.mubr.f32.mxu1 %v2472_v1 }
  0x2d   : > { %vm1262_vm1 = vcmp.eq.s32.totalorder %v2628_v24, %v1245_v16  ;;  %vm1258_vm2 = vcmp.eq.s32.totalorder %v2574_v2, %v1245_v16 }
  0x2e   : > { %v2275_v22 = vsel %vm1262_vm1, 1.0, %v2472_v1  ;;  %vm2332_vm5 = vmpackc.low %vm1291_vm9, %vm1258_vm2 }
  0x2f   : > { %2242 = vmatmul.mubr.msk.f32.gmra.mrb[2].mxu0 %vm577_vm0, %v576_v18  ;;  %2246 = vmatmul.mubr.msk.f32.gmra.mrb[2].mxu1 %vm577_vm0, %v576_v18  ;;  %vm2335_vm0 = vmpackc.low %vm1291_vm9, %vm1261_vm15  ;;  %v1237_v18 = vrot.slane %v2586_v7, %v1236_v4  ;;  %v2331_v23 = vpack.c.bf16 %v2275_v22, %v2473_v17 }
  0x30   : > { %832 = vmatprep.mubr.f32.mxu0 %v2472_v1  ;;  %921 = vmatprep.mubr.f32.mxu1 %v2472_v1 }
  0x31   : > { %v1253_v7 = vrot.slane %v1237_v18, %v2617_v21  ;;  %v454_v21 = vld [vmem:[%s2976_s6] sm:$0xff] }
  0x33   : > { %vm1264_vm3 = vcmp.eq.s32.totalorder %v2628_v24, %v1253_v7  ;;  %vm1260_vm10 = vcmp.eq.s32.totalorder %v2574_v2, %v1253_v7  ;;  %v455_v24 = vld [vmem:[%s2976_s6 + $0x8] sm:$0xff] }
  0x34   : > { %v2277_v25 = vsel %vm1264_vm3, 1.0, %v2472_v1  ;;  %vm2338_vm11 = vmpackc.low %vm1291_vm9, %vm1260_vm10  ;;  %vm1284_vm9 = vcmask 97280  }
  0xfe   : > { %v650_v26 = vpop.f32.mrb[0].mxu0  ;;  %v727_v27 = vpop.f32.mrb[0].mxu1 }
  0xff   : > { %v652_v30 = vpop.f32.mrb[1].mxu0  ;;  %v729_v31 = vpop.f32.mrb[1].mxu1  ;;  %v1181_v33 = vmul.f32 %v650_v26, %v650_v26  ;;  %v1183_v34 = vmul.f32 %v727_v27, %v727_v27 }
 0x100   : > { %v1182_v54 = vmul.f32 %v652_v30, %v652_v30  ;;  %v1184_v10 = vmul.f32 %v729_v31, %v729_v31 }
 0x102   : > { %v656_v35 = vpop.f32.mrb[2].mxu0  ;;  %v733_v36 = vpop.f32.mrb[2].mxu1 }
 0x103   : > { %v2319_v38 = vpack.c.bf16 %v656_v35, %v650_v26  ;;  %v1145_v39 = vsel %vm755_vm6, %v656_v35, 0.0  ;;  %v1185_v40 = vmul.f32 %v656_v35, %v656_v35  ;;  %v2325_v41 = vpack.c.bf16 %v733_v36, %v727_v27  ;;  %v658_v42 = vpop.f32.mrb[3].mxu0  ;;  %v735_v43 = vpop.f32.mrb[3].mxu1  ;;  %v1761_v35 = vld [vmem:[%s2977_s7 + $0x8] sm:$0xff] }
 0x104   : > { %v2651_v45 = vadd.f32 %v1145_v39, %v650_v26  ;;  %v1161_v46 = vsel %vm755_vm6, %v733_v36, 0.0  ;;  %v1187_v47 = vmul.f32 %v733_v36, %v733_v36  ;;  %v2316_v48 = vpack.c.bf16 %v658_v42, %v652_v30  ;;  %v1763_v36 = vld [vmem:[%s2977_s7 + $0x18] sm:$0xff]  ;;  %v2000_v39 = vld [vmem:[%s2980_s10] sm:$0xff] }
 0x105   : > { %v1189_v49 = vsel %vm755_vm6, %v1185_v40, 0.0  ;;  %v2655_v50 = vadd.f32 %v1161_v46, %v727_v27  ;;  %v1153_v51 = vsel %vm755_vm6, %v658_v42, 0.0  ;;  %v1186_v52 = vmul.f32 %v658_v42, %v658_v42  ;;  %v456_v27 = vld [vmem:[%s2976_s6 + $0x10] sm:$0xff]  ;;  %v2001_v40 = vld [vmem:[%s2980_s10 + $0x8] sm:$0xff] }
 0x106   : > { %v2661_v55 = vadd.f32 %v1189_v49, %v1181_v33  ;;  %v1205_v56 = vsel %vm755_vm6, %v1187_v47, 0.0  ;;  %v2664_v57 = vadd.f32 %v1153_v51, %v652_v30  ;;  %2318 = vmatprep.subr.msk.bf16.mxu0 %vm2647_vm12, %v2316_v48  ;;  %v2322_v60 = vpack.c.bf16 %v735_v43, %v729_v31  ;;  %v1283_v30 = vld [vmem:[%s2973_s3 + $0x8] sm:$0x3]  ;;  %v1762_v33 = vld [vmem:[%s2977_s7 + $0x10] sm:$0xff] }
 0x107   : > { %v2668_v58 = vadd.f32 %v1205_v56, %v1183_v34  ;;  %v1197_v59 = vsel %vm755_vm6, %v1186_v52, 0.0  ;;  %2321 = vmatpush1.bf16.msk.msra.mxu0 %vm2647_vm12, %v2319_v38  ;;  %v1169_v5 = vsel %vm755_vm6, %v735_v43, 0.0  ;;  %v1188_v6 = vmul.f32 %v735_v43, %v735_v43  ;;  %v1819_v38 = vld [vmem:[%s2979_s9 + $0x8] sm:$0xff] }
 0x108   : > { %v2677_v62 = vadd.f32 %v1197_v59, %v1182_v54  ;;  %2259 = vmatprep.subr.msk.mxu0 %vm464_vm8, %v2640_v32  ;;  %2324 = vmatprep.subr.msk.bf16.mxu1 %vm2647_vm12, %v2322_v60  ;;  %v2702_v11 = vadd.f32 %v1169_v5, %v729_v31  ;;  %v2337_v26 = vpack.c.bf16 %v2277_v25, %v2473_v17  ;;  %v457_v17 = vld [vmem:[%s2976_s6 + $0x18] sm:$0xff]  ;;  %v1760_v31 = vld [vmem:[%s2977_s7] sm:$0xff]  ;;  %v2475_v34 = vmov 0  }
 0x109   : > { %2327 = vmatpush1.bf16.msk.msra.mxu1 %vm2647_vm12, %v2325_v41  ;;  %v1213_v12 = vsel %vm755_vm6, %v1188_v6, 0.0  ;;  %2424 = vset.pattern.permute.xlu0 %v2475_v34  ;;  %v493_v41 = vmul.f32 %v2632_v28, %v2632_v28  ;;  %v494_v42 = vmul.f32 %v2659_v53, %v2659_v53  ;;  %v465_v43 = vsel %vm464_vm8, %v2632_v28, 0.0 }
 0x10a   : > { %2249 = vmatmul.mubr.msk.f32.vlgmr.msra.gmra.mrb[4].mxu0 %vm742_vm7, %v738_v61  ;;  %2265 = vmatprep.subr.msk.mxu1 %vm464_vm8, %v2683_v63  ;;  %v2714_v15 = vadd.f32 %v1213_v12, %v1184_v10  ;;  %v472_v47 = vsel %vm464_vm8, %v2640_v32, 0.0  ;;  %v479_v49 = vsel %vm464_vm8, %v2659_v53, 0.0  ;;  %v486_v52 = vsel %vm464_vm8, %v2683_v63, 0.0 }
 0x10b   : > { %838 = vmatprep.mubr.f32.mxu0 %v2472_v1  ;;  %2260 = vmatpush1.msk.msra.mxu0 %vm464_vm8, %v2632_v28  ;;  %v497_v46 = vcombine.high %v493_v41, %v493_v41  ;;  %v501_v48 = vsel %vm464_vm8, %v493_v41, 0.0  ;;  %v498_v51 = vcombine.high %v494_v42, %v494_v42  ;;  %v515_v54 = vsel %vm464_vm8, %v494_v42, 0.0 }
 0x10c   : > { %2255 = vmatmul.mubr.msk.f32.vlgmr.msra.gmra.mrb[4].mxu1 %vm742_vm7, %v738_v61  ;;  %2330 = vmatprep.subr.msk.bf16.mxu0 %vm2329_vm14, %v2328_v8  ;;  %v466_v56 = vrot.slane %v465_v43, 4  ;;  %v473_v59 = vrot.slane %v472_v47, 4  ;;  %v502_v60 = vrot.slane %v501_v48, 4  ;;  %v480_v61 = vrot.slane %v479_v49, 4 }
 0x10d   : > { %927 = vmatprep.mubr.f32.mxu1 %v2472_v1  ;;  %2266 = vmatpush1.msk.msra.mxu1 %vm464_vm8, %v2659_v53  ;;  %v508_v28 = vsel %vm464_vm8, %v497_v46, 0.0  ;;  %v1147_v3 = vrot.slane %v2651_v45, 4  ;;  %v487_v32 = vrot.slane %v486_v52, 4  ;;  %v516_v4 = vrot.slane %v515_v54, 4 }
 0x10e   : > { %2250 = vmatmul.mubr.msk.f32.gmra.mrb[6].mxu0 %vm742_vm7, %v739_v13  ;;  %2336 = vmatprep.subr.msk.bf16.mxu1 %vm2335_vm0, %v2334_v14  ;;  %v522_v5 = vsel %vm464_vm8, %v498_v51, 0.0  ;;  %v1191_v53 = vrot.slane %v2661_v55, 4  ;;  %v1163_v6 = vrot.slane %v2655_v50, 4  ;;  %v1207_v63 = vrot.slane %v2668_v58, 4 }
 0x10f   : > { %844 = vmatprep.mubr.f32.mxu0 %v2472_v1  ;;  %2425 = vset.pattern.permute.xlu1 %v2475_v34  ;;  %v1155_v8 = vrot.slane %v2664_v57, 4  ;;  %v1199_v9 = vrot.slane %v2677_v62, 4  ;;  %v1171_v10 = vrot.slane %v2702_v11, 4  ;;  %v509_v12 = vrot.slane %v508_v28, 4 }
 0x110   : > { %2256 = vmatmul.mubr.msk.f32.gmra.mrb[6].mxu1 %vm742_vm7, %v739_v13  ;;  %1766 = vperm.xlu0 %2424, %v1760_v31   ;;  %v467_v13 = vadd.f32 %v466_v56, %v465_v43  ;;  %v474_v14 = vadd.f32 %v473_v59, %v472_v47  ;;  %v503_v16 = vadd.f32 %v502_v60, %v501_v48  ;;  %v523_v22 = vrot.slane %v522_v5, 4 }
 0x111   : > { %933 = vmatprep.mubr.f32.mxu1 %v2472_v1  ;;  %1776 = vperm.xlu1 %2425, %v1762_v33   ;;  %v481_v18 = vadd.f32 %v480_v61, %v479_v49  ;;  %v488_v7 = vadd.f32 %v487_v32, %v486_v52  ;;  %v1208_v25 = vadd.f32 %v1207_v63, %v2668_v58 }
 0x112   : > { %2251 = vmatmul.mubr.msk.f32.gmra.mrb[8].mxu0 %vm742_vm7, %v740_v19  ;;  %v504_v31 = vrot.slane %v503_v16, 2 }
 0x113   : > { %850 = vmatprep.mubr.f32.mxu0 %v2472_v1  ;;  %v482_v33 = vrot.slane %v481_v18, 2  ;;  %v1209_v58 = vrot.slane %v1208_v25, 2 }
 0x114   : > { %2257 = vmatmul.mubr.msk.f32.gmra.mrb[8].mxu1 %vm742_vm7, %v740_v19  ;;  %1771 = vperm.xlu0 %2424, %v1761_v35   ;;  %v1148_v19 = vadd.f32 %v1147_v3, %v2651_v45  ;;  %v475_v45 = vrot.slane %v474_v14, 2  ;;  %v489_v35 = vrot.slane %v488_v7, 2  ;;  %v505_v42 = vadd.f32 %v504_v31, %v503_v16 }
 0x115   : > { %939 = vmatprep.mubr.f32.mxu1 %v2472_v1  ;;  %1781 = vperm.xlu1 %2425, %v1763_v36   ;;  %v524_v36 = vadd.f32 %v523_v22, %v522_v5  ;;  %v483_v43 = vadd.f32 %v482_v33, %v481_v18 }
 0x116   : > { %2252 = vmatmul.mubr.msk.f32.gmra.mrb[10].mxu0 %vm742_vm7, %v741_v20  ;;  %v1149_v34 = vrot.slane %v1148_v19, 2  ;;  %v490_v47 = vadd.f32 %v489_v35, %v488_v7 }
 0x117   : > { %1031 = vmatprep.mubr.f32.mxu0 %v2472_v1  ;;  %v525_v49 = vrot.slane %v524_v36, 2 }
 0x118   : > { %2258 = vmatmul.mubr.msk.f32.gmra.mrb[10].mxu1 %vm742_vm7, %v741_v20  ;;  %1822 = vperm.xlu0 %2424, %v1818_v37   ;;  %v517_v20 = vadd.f32 %v516_v4, %v515_v54  ;;  %v1150_v46 = vadd.f32 %v1149_v34, %v1148_v19  ;;  %v1210_v54 = vadd.f32 %v1209_v58, %v1208_v25  ;;  %v484_v4 = vrot.slane %v483_v43, 1 }
 0x119   : > { %1120 = vmatprep.mubr.f32.mxu1 %v2472_v1  ;;  %1827 = vperm.xlu1 %2425, %v1819_v38   ;;  %v526_v63 = vadd.f32 %v525_v49, %v524_v36 }
 0x11a   : > { %2261 = vmatmul.mubr.msk.f32.vlgmr.msra.gmra.mrb[4].mxu0 %vm946_vm4, %v454_v21  ;;  %v1151_v5 = vrot.slane %v1150_v46, 1  ;;  %v485_v22 = vadd.f32 %v484_v4, %v483_v43 }
 0x11b   : > { %1037 = vmatprep.mubr.f32.mxu0 %v2472_v1  ;;  %2333 = vmatpush1.bf16.msk.msra.mxu0 %vm2332_vm5, %v2331_v23  ;;  %v1164_v23 = vadd.f32 %v1163_v6, %v2655_v50 }
 0x11c   : > { %2267 = vmatmul.mubr.msk.f32.vlgmr.msra.gmra.mrb[4].mxu1 %vm946_vm4, %v454_v21  ;;  %2004 = vperm.xlu0 %2424, %v2000_v39   ;;  %v1192_v21 = vadd.f32 %v1191_v53, %v2661_v55  ;;  %v518_v55 = vrot.slane %v517_v20, 2  ;;  %v491_v53 = vrot.slane %v490_v47, 1 }
 0x11d   : > { %1126 = vmatprep.mubr.f32.mxu1 %v2472_v1  ;;  %2339 = vmatpush1.bf16.msk.msra.mxu1 %vm2338_vm11, %v2337_v26  ;;  %v1200_v26 = vadd.f32 %v1199_v9, %v2677_v62  ;;  %v1165_v37 = vrot.slane %v1164_v23, 2 }
 0x11e   : > { %2262 = vmatmul.mubr.msk.f32.gmra.mrb[6].mxu0 %vm946_vm4, %v455_v24  ;;  %2009 = vperm.xlu1 %2425, %v2001_v40   ;;  %v1193_v50 = vrot.slane %v1192_v21, 2  ;;  %v476_v40 = vadd.f32 %v475_v45, %v474_v14  ;;  %v519_v48 = vadd.f32 %v518_v55, %v517_v20 }
 0x11f   : > { %1043 = vmatprep.mubr.f32.mxu0 %v2472_v1  ;;  %v1166_v52 = vadd.f32 %v1165_v37, %v1164_v23  ;;  %v492_v23 = vadd.f32 %v491_v53, %v490_v47 }
 0x120   : > { %2268 = vmatmul.mubr.msk.f32.gmra.mrb[6].mxu1 %vm946_vm4, %v455_v24  ;;  %v1156_v24 = vadd.f32 %v1155_v8, %v2664_v57  ;;  %v1201_v57 = vrot.slane %v1200_v26, 2  ;;  %v1194_v51 = vadd.f32 %v1193_v50, %v1192_v21  ;;  %v477_v3 = vrot.slane %v476_v40, 1 }
 0x121   : > { %1132 = vmatprep.mubr.f32.mxu1 %v2472_v1  ;;  %v520_v6 = vrot.slane %v519_v48, 1  ;;  %v1167_v9 = vrot.slane %v1166_v52, 1  ;;  %v1152_v21 = vadd.f32 %v1151_v5, %v1150_v46 }
 0x122   : > { %2263 = vmatmul.mubr.msk.f32.gmra.mrb[8].mxu0 %vm946_vm4, %v456_v27  ;;  %v1157_v38 = vrot.slane %v1156_v24, 2  ;;  %v1202_v59 = vadd.f32 %v1201_v57, %v1200_v26  ;;  %v1195_v8 = vrot.slane %v1194_v51, 1  ;;  %v478_v19 = vadd.f32 %v477_v3, %v476_v40 }
 0x123   : > { %1049 = vmatprep.mubr.f32.mxu0 %v2472_v1  ;;  %v521_v25 = vadd.f32 %v520_v6, %v519_v48 }
 0x124   : > { %2269 = vmatmul.mubr.msk.f32.gmra.mrb[8].mxu1 %vm946_vm4, %v456_v27  ;;  %v1172_v27 = vadd.f32 %v1171_v10, %v2702_v11  ;;  %v1158_v56 = vadd.f32 %v1157_v38, %v1156_v24  ;;  %v1211_v10 = vrot.slane %v1210_v54, 1  ;;  %v527_v24 = vrot.slane %v526_v63, 1 }
 0x125   : > { %1138 = vmatprep.mubr.f32.mxu1 %v2472_v1  ;;  %v1196_v26 = vadd.f32 %v1195_v8, %v1194_v51 }
 0x126   : > { %2264 = vmatmul.mubr.msk.f32.gmra.mrb[10].mxu0 %vm946_vm4, %v457_v17  ;;  %v1173_v39 = vrot.slane %v1172_v27, 2  ;;  %v2848_v36 = vadd.f32 %v527_v24, %v526_v63 }
 0x127   : > { %1368 = vmatprep.mubr.f32.mxu0 %v2472_v1 }
 0x128   : > { %2270 = vmatmul.mubr.msk.f32.gmra.mrb[10].mxu1 %vm946_vm4, %v457_v17  ;;  %v1215_v17 = vrot.slane %v2714_v15, 4  ;;  %v1174_v60 = vadd.f32 %v1173_v39, %v1172_v27  ;;  %v1168_v27 = vadd.f32 %v1167_v9, %v1166_v52 }
 0x129   : > { %1445 = vmatprep.mubr.f32.mxu1 %v2472_v1 }
 0x12a   : > { %2283 = vmatmul.mubr.msk.f32.vlgmr.msra.gmra.mrb[12].mxu0 %vm1284_vm9, %v1282_v29  ;;  %v1216_v62 = vadd.f32 %v1215_v17, %v2714_v15  ;;  %v506_v15 = vrot.slane %v505_v42, 1  ;;  %v1175_v14 = vrot.slane %v1174_v60, 1  ;;  %v1212_v17 = vadd.f32 %v1211_v10, %v1210_v54  ;;  %v1458_v10 = vld [vmem:[%s2975_s5] sm:$0xff] }
 0x12b   : > { %1374 = vmatprep.mubr.f32.mxu0 %v2472_v1  ;;  %v2852_v58 = vadd.f32 %v1168_v27, %v485_v22 }
 0x12c   : > { %2289 = vmatmul.mubr.msk.f32.vlgmr.msra.gmra.mrb[12].mxu1 %vm1284_vm9, %v1282_v29  ;;  %v510_v29 = vadd.f32 %v509_v12, %v508_v28  ;;  %v1217_v28 = vrot.slane %v1216_v62, 2  ;;  %v1159_v12 = vrot.slane %v1158_v56, 1  ;;  %v507_v20 = vadd.f32 %v506_v15, %v505_v42 }
 0x12d   : > { %1451 = vmatprep.mubr.f32.mxu1 %v2472_v1  ;;  %v1176_v45 = vadd.f32 %v1175_v14, %v1174_v60  ;;  %v2854_v38 = vadd.f32 %v1212_v17, %v521_v25 }
 0x12e   : > { %2284 = vmatmul.mubr.msk.f32.gmra.mrb[14].mxu0 %vm1284_vm9, %v1283_v30  ;;  %v511_v11 = vrot.slane %v510_v29, 2  ;;  %v1218_v16 = vadd.f32 %v1217_v28, %v1216_v62  ;;  %v2850_v37 = vadd.f32 %v1196_v26, %v507_v20 }
 0x12f   : > { %1550 = vmatprep.mubr.f32.mxu0 %v2472_v1  ;;  %v2862_v42 = vadd.f32 %v1176_v45, %v492_v23 }
 0x130   : > { %2290 = vmatmul.mubr.msk.f32.gmra.mrb[14].mxu1 %vm1284_vm9, %v1283_v30  ;;  %v468_v30 = vrot.slane %v467_v13, 2  ;;  %v512_v61 = vadd.f32 %v511_v11, %v510_v29  ;;  %v1160_v29 = vadd.f32 %v1159_v12, %v1158_v56  ;;  %v1219_v31 = vrot.slane %v1218_v16, 1 }
 0x131   : > { %1639 = vmatprep.mubr.f32.mxu1 %v2472_v1 }
 0x132   : > { %v469_v41 = vadd.f32 %v468_v30, %v467_v13  ;;  %v1203_v13 = vrot.slane %v1202_v59, 1  ;;  %v513_v18 = vrot.slane %v512_v61, 1  ;;  %v2856_v57 = vadd.f32 %v1160_v29, %v478_v19  ;;  %v1459_v29 = vld [vmem:[%s2975_s5 + $0x8] sm:$0xff] }
 0x133   : > { %v2858_v39 = vadd.f32 %v1219_v31, %v1218_v16 }
 0x134   : > { %v470_v32 = vrot.slane %v469_v41, 1  ;;  %v1204_v30 = vadd.f32 %v1203_v13, %v1202_v59  ;;  %v514_v34 = vadd.f32 %v513_v18, %v512_v61 }
 0x136   : > { %v471_v7 = vadd.f32 %v470_v32, %v469_v41  ;;  %v2860_v41 = vadd.f32 %v1204_v30, %v514_v34 }
 0x138   : > { %v2846_v55 = vadd.f32 %v1152_v21, %v471_v7 }
 0x1fd   : > { %v1370_v33 = vpop.f32.mrb[12].mxu0 }
 0x1fe   : > { %v1372_v35 = vpop.f32.mrb[13].mxu0  ;;  %v1716_v62 = vmul.f32 %v1370_v33, %v1370_v33 }
 0x1ff   : > { %v1447_v50 = vpop.f32.mrb[12].mxu1  ;;  %v1717_v43 = vmul.f32 %v1372_v35, %v1372_v35 }
 0x200   : > { %v1449_v11 = vpop.f32.mrb[13].mxu1  ;;  %v1718_v59 = vmul.f32 %v1447_v50, %v1447_v50 }
 0x201   : > { %v1376_v40 = vpop.f32.mrb[14].mxu0  ;;  %v1719_v60 = vmul.f32 %v1449_v11, %v1449_v11 }
 0x202   : > { %v2343_v46 = vpack.c.bf16 %v1376_v40, %v1370_v33  ;;  %v1680_v47 = vsel %vm755_vm6, %v1376_v40, 0.0  ;;  %v1720_v48 = vmul.f32 %v1376_v40, %v1376_v40  ;;  %v1378_v49 = vpop.f32.mrb[15].mxu0 }
 0x203   : > { %v1681_v51 = vadd.f32 %v1680_v47, %v1370_v33  ;;  %v2340_v52 = vpack.c.bf16 %v1378_v49, %v1372_v35  ;;  %v1688_v54 = vsel %vm755_vm6, %v1378_v49, 0.0  ;;  %v1721_v56 = vmul.f32 %v1378_v49, %v1378_v49  ;;  %v1453_v61 = vpop.f32.mrb[14].mxu1 }
 0x204   : > { %v1724_v28 = vsel %vm755_vm6, %v1720_v48, 0.0  ;;  %v1689_v3 = vadd.f32 %v1688_v54, %v1372_v35  ;;  %v2349_v4 = vpack.c.bf16 %v1453_v61, %v1447_v50  ;;  %v1696_v5 = vsel %vm755_vm6, %v1453_v61, 0.0  ;;  %v1455_v53 = vpop.f32.mrb[15].mxu1 }
 0x205   : > { %v1682_v32 = vrot.slane %v1681_v51, 4  ;;  %v1725_v15 = vadd.f32 %v1724_v28, %v1716_v62  ;;  %2342 = vmatprep.subr.msk.bf16.mxu0 %vm2647_vm12, %v2340_v52  ;;  %v1697_v6 = vadd.f32 %v1696_v5, %v1447_v50  ;;  %v1722_v63 = vmul.f32 %v1453_v61, %v1453_v61 }
 0x206   : > { %v1690_v8 = vrot.slane %v1689_v3, 4  ;;  %v1732_v9 = vsel %vm755_vm6, %v1721_v56, 0.0  ;;  %2345 = vmatpush1.bf16.msk.msra.mxu0 %vm2647_vm12, %v2343_v46  ;;  %v2346_v16 = vpack.c.bf16 %v1455_v53, %v1449_v11  ;;  %v1704_v20 = vsel %vm755_vm6, %v1455_v53, 0.0 }
 0x207   : > { %v1683_v12 = vadd.f32 %v1682_v32, %v1681_v51  ;;  %v1726_v13 = vrot.slane %v1725_v15, 4  ;;  %v1733_v14 = vadd.f32 %v1732_v9, %v1717_v43  ;;  %v1698_v18 = vrot.slane %v1697_v6, 4  ;;  %v1460_v51 = vld [vmem:[%s2975_s5 + $0x10] sm:$0xff]  ;;  %v1461_v9 = vld [vmem:[%s2975_s5 + $0x18] sm:$0xff] }
 0x208   : > { %v1740_v19 = vsel %vm755_vm6, %v1722_v63, 0.0  ;;  %v1691_v7 = vadd.f32 %v1690_v8, %v1689_v3  ;;  %2348 = vmatprep.subr.msk.bf16.mxu1 %vm2647_vm12, %v2346_v16  ;;  %v1705_v27 = vadd.f32 %v1704_v20, %v1449_v11  ;;  %v1723_v17 = vmul.f32 %v1455_v53, %v1455_v53 }
 0x209   : > { %v1684_v22 = vrot.slane %v1683_v12, 2  ;;  %v1727_v21 = vadd.f32 %v1726_v13, %v1725_v15  ;;  %v1741_v23 = vadd.f32 %v1740_v19, %v1718_v59  ;;  %v1734_v25 = vrot.slane %v1733_v14, 4  ;;  %2293 = vmatmul.mubr.msk.f32.vlgmr.msra.gmra.mrb[4].mxu0 %vm742_vm7, %v1458_v10  ;;  %2351 = vmatpush1.bf16.msk.msra.mxu1 %vm2647_vm12, %v2349_v4 }
 0x20a   : > { %v1699_v24 = vadd.f32 %v1698_v18, %v1697_v6  ;;  %v1692_v26 = vrot.slane %v1691_v7, 2  ;;  %1556 = vmatprep.mubr.f32.mxu0 %v2472_v1  ;;  %v1706_v50 = vrot.slane %v1705_v27, 4  ;;  %v1748_v62 = vsel %vm755_vm6, %v1723_v17, 0.0 }
 0x20b   : > { %v1685_v30 = vadd.f32 %v1684_v22, %v1683_v12  ;;  %v1728_v45 = vrot.slane %v1727_v21, 2  ;;  %v1742_v31 = vrot.slane %v1741_v23, 4  ;;  %v1735_v33 = vadd.f32 %v1734_v25, %v1733_v14 }
 0x20c   : > { %v1700_v34 = vrot.slane %v1699_v24, 2  ;;  %v1693_v35 = vadd.f32 %v1692_v26, %v1691_v7  ;;  %2299 = vmatmul.mubr.msk.f32.vlgmr.msra.gmra.mrb[4].mxu1 %vm742_vm7, %v1458_v10  ;;  %v1707_v48 = vadd.f32 %v1706_v50, %v1705_v27  ;;  %v1749_v49 = vadd.f32 %v1748_v62, %v1719_v60 }
 0x20d   : > { %v1686_v11 = vrot.slane %v1685_v30, 1  ;;  %v1729_v40 = vadd.f32 %v1728_v45, %v1727_v21  ;;  %v1743_v43 = vadd.f32 %v1742_v31, %v1741_v23  ;;  %v1736_v44 = vrot.slane %v1735_v33, 2  ;;  %2294 = vmatmul.mubr.msk.f32.gmra.mrb[6].mxu0 %vm742_vm7, %v1459_v29  ;;  %1645 = vmatprep.mubr.f32.mxu1 %v2472_v1 }
 0x20e   : > { %v1701_v46 = vadd.f32 %v1700_v34, %v1699_v24  ;;  %v1694_v47 = vrot.slane %v1693_v35, 1  ;;  %1562 = vmatprep.mubr.f32.mxu0 %v2472_v1  ;;  %v1708_v3 = vrot.slane %v1707_v48, 2  ;;  %v1750_v32 = vrot.slane %v1749_v49, 4 }
 0x20f   : > { %v1687_v52 = vadd.f32 %v1686_v11, %v1685_v30  ;;  %v1730_v54 = vrot.slane %v1729_v40, 1  ;;  %v1744_v56 = vrot.slane %v1743_v43, 2  ;;  %v1737_v59 = vadd.f32 %v1736_v44, %v1735_v33  ;;  %v1777_v33 = vpop.permute.xlu1 %1776 }
 0x210   : > { %v1702_v28 = vrot.slane %v1701_v46, 1  ;;  %v1695_v61 = vadd.f32 %v1694_v47, %v1693_v35  ;;  %2300 = vmatmul.mubr.msk.f32.gmra.mrb[6].mxu1 %vm742_vm7, %v1459_v29  ;;  %v1709_v63 = vadd.f32 %v1708_v3, %v1707_v48  ;;  %v1751_v8 = vadd.f32 %v1750_v32, %v1749_v49 }
 0x211   : > { %v1712_v15 = vadd.f32 %v1687_v52, %v2846_v55  ;;  %v1731_v4 = vadd.f32 %v1730_v54, %v1729_v40  ;;  %v1745_v60 = vadd.f32 %v1744_v56, %v1743_v43  ;;  %v1738_v5 = vrot.slane %v1737_v59, 1  ;;  %2295 = vmatmul.mubr.msk.f32.gmra.mrb[8].mxu0 %vm742_vm7, %v1460_v51  ;;  %1651 = vmatprep.mubr.f32.mxu1 %v2472_v1 }
 0x212   : > { %v1703_v53 = vadd.f32 %v1702_v28, %v1701_v46  ;;  %v1713_v6 = vadd.f32 %v1695_v61, %v2856_v57  ;;  %1568 = vmatprep.mubr.f32.mxu0 %v2472_v1  ;;  %v1710_v16 = vrot.slane %v1709_v63, 1  ;;  %v1752_v18 = vrot.slane %v1751_v8, 2 }
 0x213   : > { %v2904_v55 = vadd.f32 %v1731_v4, %v2850_v37  ;;  %v2906_v10 = vmul.f32 %v1712_v15, %v1712_v15  ;;  %v1746_v12 = vrot.slane %v1745_v60, 1  ;;  %v1739_v13 = vadd.f32 %v1738_v5, %v1737_v59  ;;  %v1782_v15 = vpop.permute.xlu1 %1781 }
 0x214   : > { %v1714_v14 = vadd.f32 %v1703_v53, %v2852_v58  ;;  %v2910_v57 = vmul.f32 %v1713_v6, %v1713_v6  ;;  %2301 = vmatmul.mubr.msk.f32.gmra.mrb[8].mxu1 %vm742_vm7, %v1460_v51  ;;  %v1711_v22 = vadd.f32 %v1710_v16, %v1709_v63  ;;  %v1753_v21 = vadd.f32 %v1752_v18, %v1751_v8 }
 0x215   : > { %v2061_v19 = vsub.f32 %v2906_v10, %v2904_v55  ;;  %v1747_v7 = vadd.f32 %v1746_v12, %v1745_v60  ;;  %v2915_v20 = vadd.f32 %v1739_v13, %v2860_v41  ;;  %2296 = vmatmul.mubr.msk.f32.gmra.mrb[10].mxu0 %vm742_vm7, %v1461_v9  ;;  %1657 = vmatprep.mubr.f32.mxu1 %v2472_v1  ;;  %vm1830_vm6 = vcmask 261120  }
 0x216   : > { %v2919_v37 = vmul.f32 %v1714_v14, %v1714_v14  ;;  %1901 = vmatprep.mubr.f32.mxu0 %v2472_v1  ;;  %v1715_v41 = vadd.f32 %v1711_v22, %v2862_v42  ;;  %v1754_v25 = vrot.slane %v1753_v21, 1  ;;  %v1224_v26 = vadd.f32 %v2858_v39, %v2848_v36  ;;  %v1767_v42 = vpop.permute.xlu0 %1766 }
 0x217   : > { %v2924_v58 = vadd.f32 %v1747_v7, %v2854_v38  ;;  %v2062_v23 = vsub.f32 %v2910_v57, %v2915_v20  ;;  %v2086_v20 = vstv %s2309_s29 }
 0x218   : > { %2302 = vmatmul.mubr.msk.f32.gmra.mrb[10].mxu1 %vm742_vm7, %v1461_v9  ;;  %v1755_v27 = vadd.f32 %v1754_v25, %v1753_v21  ;;  %v2934_v17 = vmul.f32 %v1715_v41, %v1715_v41  ;;  %vm2146_vm7 = vcmp.lt.s32.totalorder %v529_v0, 512 }
 0x219   : > { %v2063_v24 = vsub.f32 %v2919_v37, %v2924_v58  ;;  %1978 = vmatprep.mubr.f32.mxu1 %v2472_v1 }
 0x21a   : > { %v2937_v38 = vadd.f32 %v1755_v27, %v1224_v26  ;;  %v1772_v31 = vpop.permute.xlu0 %1771 }
 0x21b   : > { %v2067_v55 = vmul.f32 0.5, %v2063_v24 }
 0x21c   : > { %v2064_v29 = vsub.f32 %v2934_v17, %v2937_v38 }
 0x21e   : > { %v2068_v57 = vmul.f32 0.5, %v2064_v29 }
 0x2dc   : > { %v1552_v30 = vpop.f32.mrb[4].mxu0 }
 0x2dd   : > { %v1554_v45 = vpop.f32.mrb[5].mxu0  ;;  %v1784_v34 = vadd.f32 %v1767_v42, %v1552_v30 }
 0x2de   : > { %v1785_v50 = vadd.f32 %v1767_v42, %v1554_v45 }
 0x2df   : > { %v1641_v35 = vpop.f32.mrb[4].mxu1  ;;  %v1800_v43 = vmax.f32 %v1784_v34, 0.0 }
 0x2e0   : > { %v1558_v62 = vpop.f32.mrb[6].mxu0  ;;  %v1643_v36 = vpop.f32.mrb[5].mxu1  ;;  %v1786_v44 = vadd.f32 %v1767_v42, %v1641_v35  ;;  %v1801_v47 = vmax.f32 %v1785_v50, 0.0 }
 0x2e1   : > { %v1788_v39 = vadd.f32 %v1772_v31, %v1558_v62  ;;  %v1560_v11 = vpop.f32.mrb[7].mxu0  ;;  %v1787_v48 = vadd.f32 %v1767_v42, %v1643_v36 }
 0x2e2   : > { %v1789_v40 = vadd.f32 %v1772_v31, %v1560_v11  ;;  %v1802_v32 = vmax.f32 %v1786_v44, 0.0 }
 0x2e3   : > { %v1804_v46 = vmax.f32 %v1788_v39, 0.0  ;;  %v1647_v49 = vpop.f32.mrb[6].mxu1  ;;  %v1803_v5 = vmax.f32 %v1787_v48, 0.0  ;;  %v1828_v48 = vpop.permute.xlu1 %1827 }
 0x2e4   : > { %v1805_v51 = vmax.f32 %v1789_v40, 0.0  ;;  %v1564_v52 = vpop.f32.mrb[8].mxu0  ;;  %v1790_v56 = vadd.f32 %v1772_v31, %v1647_v49  ;;  %v1649_v59 = vpop.f32.mrb[7].mxu1  ;;  %v1817_v40 = vld [vmem:[%s2978_s8 + $0x8] sm:$0xff] }
 0x2e5   : > { %v2354_v54 = vpack.c.bf16 %v1804_v46, %v1800_v43  ;;  %v1566_v28 = vpop.f32.mrb[9].mxu0  ;;  %v1791_v3 = vadd.f32 %v1772_v31, %v1649_v59  ;;  %v1792_v60 = vadd.f32 %v1777_v33, %v1564_v52  ;;  %v1823_v43 = vpop.permute.xlu0 %1822 }
 0x2e6   : > { %v2352_v61 = vpack.c.bf16 %v1805_v51, %v1801_v47  ;;  %v1806_v4 = vmax.f32 %v1790_v56, 0.0  ;;  %v1793_v63 = vadd.f32 %v1777_v33, %v1566_v28 }
 0x2e7   : > { %v1807_v53 = vmax.f32 %v1791_v3, 0.0  ;;  %v1653_v6 = vpop.f32.mrb[8].mxu1  ;;  %v1808_v7 = vmax.f32 %v1792_v60, 0.0 }
 0x2e8   : > { %v1570_v8 = vpop.f32.mrb[10].mxu0  ;;  %2353 = vmatprep.subr.bf16.mxu0 %v2352_v61  ;;  %v2362_v9 = vpack.c.bf16 %v1806_v4, %v1802_v32  ;;  %v1655_v12 = vpop.f32.mrb[9].mxu1  ;;  %v1794_v22 = vadd.f32 %v1777_v33, %v1653_v6  ;;  %v1809_v41 = vmax.f32 %v1793_v63, 0.0 }
 0x2e9   : > { %v1796_v13 = vadd.f32 %v1782_v15, %v1570_v8  ;;  %v1572_v14 = vpop.f32.mrb[11].mxu0  ;;  %2355 = vmatpush1.bf16.msra.mxu0 %v2354_v54  ;;  %v2360_v16 = vpack.c.bf16 %v1807_v53, %v1803_v5  ;;  %v1795_v25 = vadd.f32 %v1777_v33, %v1655_v12  ;;  %v1816_v33 = vld [vmem:[%s2978_s8] sm:$0xff]  ;;  %v2005_v4 = vpop.permute.xlu0 %2004 }
 0x2ea   : > { %v1797_v18 = vadd.f32 %v1782_v15, %v1572_v14  ;;  %v1810_v35 = vmax.f32 %v1794_v22, 0.0 }
 0x2eb   : > { %v1812_v21 = vmax.f32 %v1796_v13, 0.0  ;;  %v1659_v26 = vpop.f32.mrb[10].mxu1  ;;  %2361 = vmatprep.subr.bf16.mxu1 %v2360_v16  ;;  %v1811_v62 = vmax.f32 %v1795_v25, 0.0 }
 0x2ec   : > { %v1813_v27 = vmax.f32 %v1797_v18, 0.0  ;;  %v1798_v30 = vadd.f32 %v1782_v15, %v1659_v26  ;;  %v1661_v45 = vpop.f32.mrb[11].mxu1  ;;  %2363 = vmatpush1.bf16.msra.mxu1 %v2362_v9 }
 0x2ed   : > { %v2358_v42 = vpack.c.bf16 %v1812_v21, %v1808_v7  ;;  %v1799_v34 = vadd.f32 %v1782_v15, %v1661_v45 }
 0x2ee   : > { %v2356_v31 = vpack.c.bf16 %v1813_v27, %v1809_v41  ;;  %v1814_v50 = vmax.f32 %v1798_v30, 0.0 }
 0x2ef   : > { %v1815_v36 = vmax.f32 %v1799_v34, 0.0 }
 0x2f0   : > { %2357 = vmatprep.subr.bf16.mxu0 %v2356_v31  ;;  %v2366_v39 = vpack.c.bf16 %v1814_v50, %v1810_v35 }
 0x2f1   : > { %2359 = vmatpush1.bf16.msra.mxu0 %v2358_v42  ;;  %v2364_v11 = vpack.c.bf16 %v1815_v36, %v1811_v62 }
 0x2f3   : > { %2365 = vmatprep.subr.bf16.mxu1 %v2364_v11 }
 0x2f4   : > { %2303 = vmatmul.mubr.msk.f32.vlgmr.msra.gmra.mrb[16].mxu0 %vm1830_vm6, %v1816_v33  ;;  %2367 = vmatpush1.bf16.msra.mxu1 %v2366_v39 }
 0x2f5   : > { %1907 = vmatprep.mubr.f32.mxu0 %v2472_v1 }
 0x2f7   : > { %2305 = vmatmul.mubr.msk.f32.vlgmr.msra.gmra.mrb[16].mxu1 %vm1830_vm6, %v1816_v33 }
 0x2f8   : > { %2304 = vmatmul.mubr.msk.f32.gmra.mrb[18].mxu0 %vm1830_vm6, %v1817_v40  ;;  %1984 = vmatprep.mubr.f32.mxu1 %v2472_v1  ;;  %v2010_v1 = vpop.permute.xlu1 %2009 }
 0x2fb   : > { %2306 = vmatmul.mubr.msk.f32.gmra.mrb[18].mxu1 %vm1830_vm6, %v1817_v40 }
 0x3c7   : > { %v1903_v44 = vpop.f32.mrb[16].mxu0 }
 0x3c8   : > { %v1904_v46 = vadd.f32 %v1903_v44, %v1823_v43  ;;  %v1905_v47 = vpop.f32.mrb[17].mxu0 }
 0x3c9   : > { %v1906_v49 = vadd.f32 %v1905_v47, %v1823_v43 }
 0x3ca   : > { %v1980_v51 = vpop.f32.mrb[16].mxu1  ;;  %v1991_v54 = vmax.f32 %v1904_v46, 0.0 }
 0x3cb   : > { %v1909_v52 = vpop.f32.mrb[18].mxu0  ;;  %v1981_v56 = vadd.f32 %v1980_v51, %v1823_v43  ;;  %v1982_v59 = vpop.f32.mrb[17].mxu1  ;;  %v1992_v3 = vmax.f32 %v1906_v49, 0.0 }
 0x3cc   : > { %v1910_v28 = vadd.f32 %v1909_v52, %v1828_v48  ;;  %v1911_v61 = vpop.f32.mrb[19].mxu0  ;;  %v1983_v32 = vadd.f32 %v1982_v59, %v1823_v43  ;;  %v2012_v6 = vmul.f32 %v2005_v4, %v1991_v54 }
 0x3cd   : > { %v1912_v15 = vadd.f32 %v1911_v61, %v1828_v48  ;;  %v1993_v63 = vmax.f32 %v1981_v56, 0.0  ;;  %v2013_v13 = vmul.f32 %v2005_v4, %v1992_v3  ;;  %v2065_v56 = vmul.f32 0.5, %v2061_v19 }
 0x3ce   : > { %v1995_v60 = vmax.f32 %v1910_v28, 0.0  ;;  %v1986_v5 = vpop.f32.mrb[18].mxu1  ;;  %v1994_v14 = vmax.f32 %v1983_v32, 0.0  ;;  %v2072_v61 = vstv %s2307_s27  ;;  %v2066_v3 = vmul.f32 0.5, %v2062_v23 }
 0x3cf   : > { %v1996_v53 = vmax.f32 %v1912_v15, 0.0  ;;  %v1987_v9 = vadd.f32 %v1986_v5, %v1828_v48  ;;  %v1988_v12 = vpop.f32.mrb[19].mxu1  ;;  %v2014_v25 = vmul.f32 %v2005_v4, %v1993_v63 }
 0x3d0   : > { %v2016_v8 = vmul.f32 %v2010_v1, %v1995_v60  ;;  %v1989_v18 = vadd.f32 %v1988_v12, %v1828_v48  ;;  %v2015_v42 = vmul.f32 %v2005_v4, %v1994_v14  ;;  %v2048_v48 = vstv %s1999_s26 }
 0x3d1   : > { %v2017_v16 = vmul.f32 %v2010_v1, %v1996_v53  ;;  %v1997_v22 = vmax.f32 %v1987_v9, 0.0  ;;  %v2077_v4 = vstv %s2308_s28  ;;  %v2074_v10 = vmul.f32 %v2072_v61, %v2066_v3 }
 0x3d2   : > { %v2020_v7 = vadd.f32 %v2016_v8, %v2012_v6  ;;  %v1998_v41 = vmax.f32 %v1989_v18, 0.0  ;;  %v2073_v6 = vmul.f32 %v2072_v61, %v2065_v56 }
 0x3d3   : > { %v2027_v21 = vadd.f32 %v2017_v16, %v2013_v13  ;;  %v2018_v27 = vmul.f32 %v2010_v1, %v1997_v22 }
 0x3d4   : > { %v2021_v26 = vrot.slane %v2020_v7, 4  ;;  %v2019_v45 = vmul.f32 %v2010_v1, %v1998_v41  ;;  %v2076_v41 = vmul.f32 %v2072_v61, %v2068_v57 }
 0x3d5   : > { %v2028_v30 = vrot.slane %v2027_v21, 4  ;;  %v2034_v34 = vadd.f32 %v2018_v27, %v2014_v25 }
 0x3d6   : > { %v2022_v31 = vadd.f32 %v2021_v26, %v2020_v7  ;;  %v2041_v50 = vadd.f32 %v2019_v45, %v2015_v42  ;;  %v2075_v7 = vmul.f32 %v2072_v61, %v2067_v55 }
 0x3d7   : > { %v2029_v35 = vadd.f32 %v2028_v30, %v2027_v21  ;;  %v2035_v36 = vrot.slane %v2034_v34, 4 }
 0x3d8   : > { %v2023_v62 = vrot.slane %v2022_v31, 2  ;;  %v2042_v33 = vrot.slane %v2041_v50, 4 }
 0x3d9   : > { %v2030_v39 = vrot.slane %v2029_v35, 2  ;;  %v2036_v40 = vadd.f32 %v2035_v36, %v2034_v34 }
 0x3da   : > { %v2024_v11 = vadd.f32 %v2023_v62, %v2022_v31  ;;  %v2043_v44 = vadd.f32 %v2042_v33, %v2041_v50 }
 0x3db   : > { %v2031_v43 = vadd.f32 %v2030_v39, %v2029_v35  ;;  %v2037_v47 = vrot.slane %v2036_v40, 2  ;;  %v2476_v39 = vmov 1966171168  }
 0x3dc   : > { %v2025_v46 = vrot.slane %v2024_v11, 1  ;;  %v2044_v51 = vrot.slane %v2043_v44, 2  ;;  %v2122_v33 = vunpack.c.l.s4 %v2476_v39 }
 0x3dd   : > { %v2032_v49 = vrot.slane %v2031_v43, 1  ;;  %v2038_v54 = vadd.f32 %v2037_v47, %v2036_v40 }
 0x3de   : > { %v2026_v52 = vadd.f32 %v2025_v46, %v2024_v11  ;;  %v2045_v28 = vadd.f32 %v2044_v51, %v2043_v44  ;;  %v2123_v11 = vunpack.c.0.s8 %v2122_v33 }
 0x3df   : > { %v2033_v59 = vadd.f32 %v2032_v49, %v2031_v43  ;;  %v2039_v15 = vrot.slane %v2038_v54, 1 }
 0x3e0   : > { %v2049_v32 = vadd.f32 %v2048_v48, %v2026_v52  ;;  %v2046_v1 = vrot.slane %v2045_v28, 1  ;;  %v2126_v46 = vsub.s32 %v2123_v11, %v2574_v2 }
 0x3e1   : > { %v2050_v60 = vadd.f32 %v2048_v48, %v2033_v59  ;;  %v2040_v53 = vadd.f32 %v2039_v15, %v2038_v54 }
 0x3e2   : > { %v2053_v5 = vmax.f32 %v2049_v32, 0.0  ;;  %v2047_v8 = vadd.f32 %v2046_v1, %v2045_v28 }
 0x3e3   : > { %v2054_v63 = vmax.f32 %v2050_v60, 0.0  ;;  %v2051_v9 = vadd.f32 %v2048_v48, %v2040_v53 }
 0x3e4   : > { %v2078_v19 = vmul.f32 %v2077_v4, %v2053_v5  ;;  %v2052_v12 = vadd.f32 %v2048_v48, %v2047_v8 }
 0x3e5   : > { %v2079_v23 = vmul.f32 %v2077_v4, %v2054_v63  ;;  %v2055_v14 = vmax.f32 %v2051_v9, 0.0 }
 0x3e6   : > { %v2082_v13 = vadd.f32 %v2078_v19, %v2073_v6  ;;  %v2056_v18 = vmax.f32 %v2052_v12, 0.0 }
 0x3e7   : > { %v2083_v16 = vadd.f32 %v2079_v23, %v2074_v10  ;;  %v2080_v21 = vmul.f32 %v2077_v4, %v2055_v14 }
 0x3e8   : > { %v2087_v22 = vadd.f32 %v2086_v20, %v2082_v13  ;;  %v2081_v58 = vmul.f32 %v2077_v4, %v2056_v18 }
 0x3e9   : > { %v2088_v37 = vadd.f32 %v2086_v20, %v2083_v16  ;;  %v2084_v25 = vadd.f32 %v2080_v21, %v2075_v7 }
 0x3ea   : > { %v2310_v24 = vmul.f32 -1.442695, %v2087_v22  ;;  %v2085_v27 = vadd.f32 %v2081_v58, %v2076_v41 }
 0x3eb   : > { %v2311_v26 = vmul.f32 -1.442695, %v2088_v37  ;;  %v2089_v17 = vadd.f32 %v2086_v20, %v2084_v25 }
 0x3ec   : > { %2428 = vpow2.f32 %v2310_v24  ;;  %v2090_v38 = vadd.f32 %v2086_v20, %v2085_v27 }
 0x3ed   : > { %2430 = vpow2.f32 %v2311_v26  ;;  %v2312_v29 = vmul.f32 -1.442695, %v2089_v17 }
 0x3ee   : > { %v2313_v42 = vmul.f32 -1.442695, %v2090_v38 }
 0x3ef   : > { %2432 = vpow2.f32 %v2312_v29 }
 0x3f0   : > { %2434 = vpow2.f32 %v2313_v42 }
 0x3f6   : > { %v2429_v30 = vpop.eup %2428 }
 0x3f7   : > { %v2431_v45 = vpop.eup %2430  ;;  %v2103_v31 = vadd.f32 1.0, %v2429_v30 }
 0x3f8   : > { %v2104_v34 = vadd.f32 1.0, %v2431_v45 }
 0x3f9   : > { %2436 = vrcp.f32 %v2103_v31  ;;  %v2433_v35 = vpop.eup %2432 }
 0x3fa   : > { %2438 = vrcp.f32 %v2104_v34  ;;  %v2435_v50 = vpop.eup %2434  ;;  %v2105_v62 = vadd.f32 1.0, %v2433_v35 }
 0x3fb   : > { %v2106_v36 = vadd.f32 1.0, %v2435_v50 }
 0x3fc   : > { %2440 = vrcp.f32 %v2105_v62 }
 0x3fd   : > { %2442 = vrcp.f32 %v2106_v36 }
 0x403   : > { %v2437_v40 = vpop.eup %2436 }
 0x404   : > { %v2439_v43 = vpop.eup %2438 }
 0x405   : > { %v2119_v44 = vcombine.low %v2437_v40, %v2439_v43 }
 0x406   : > { %v2441_v47 = vpop.eup %2440 }
 0x407   : > { %v2443_v48 = vpop.eup %2442  ;;  %v2127_v49 = vrot.slane %v2119_v44, %v2126_v46 }
 0x408   : > { %v2120_v51 = vcombine.low %v2441_v47, %v2443_v48 }
 0x40a   : > { %v2134_v52 = vrot.slane %v2120_v51, %v2126_v46 }
 0x40c   : > { %v2135_v54 = vcombine.low %v2127_v49, %v2134_v52 }
 0x40e   : > { %v2142_v56 = vrot.slane %v2135_v54, %v2126_v46 }
 0x410   : > { %2148 = vst.msk [vmem:[%s449_s15] sm:$0xf] %vm2146_vm7, %v2142_v56 }
 0x411 PF: > { %s23_s21 = sadd.s32 1, %s2469_s21  }
 0x412   : > { %p20_p1 = scmp.ge.s32.totalorder %s23_s21, 4  }
 0x414   :  { %22 = sbr.rel (!%p20_p1) target bundleno = 1 (0x1), region = 106 }
 0x41b   :  { %2169 = vsyncpa [#allocation3], 1 }
 0x41c   :  { %2171 = vsyncpa [#allocation3 + $0x1], 1 }

</bundles_post_ra>
